<compile_context>
chip_gen: v7x
topology: tpu7x:2x2x1
jax: 0.10.0
libtpu: 0.0.40
codegen_flags: <defaults>
</compile_context>

<pallas_src>
import numpy as np
import jax
import jax.numpy as jnp
from jax.experimental import pallas as pl
from jax.experimental.pallas import tpu as pltpu

PAD_IDX = 0
NEG_INF = -1e20  # parlai neginf(float32)
_VMEM_LIMIT = 32 * 1024 * 1024  # safe on v5e (128M), v6e (128M), v7x (64M)


def _round_up(x, m):
    return ((x + m - 1) // m) * m


# ----------------------------------------------------------------------------
# Kernel 1: bag-of-words embedding with mean reduction (tiled over rows)
# ----------------------------------------------------------------------------
def _bow_kernel(ids_ref, w_ref, out_ref):
    ids = ids_ref[...]                       # (TN, S) int32
    w = w_ref[...]                           # (V, E') f32, E' % 128 == 0
    tn, s = ids.shape
    v = w.shape[0]
    vocab = jax.lax.broadcasted_iota(jnp.int32, (tn, v), 1)   # (TN, V)
    counts = jnp.zeros((tn, v), jnp.float32)
    lens = jnp.zeros((tn, 1), jnp.float32)
    # S is small and static: unrolled accumulation keeps everything 2D/lane-dense.
    for j in range(s):
        tok = ids[:, j:j + 1]                                 # (TN, 1)
        valid = tok != PAD_IDX
        counts = counts + ((tok == vocab) & valid).astype(jnp.float32)
        lens = lens + valid.astype(jnp.float32)
    summed = jnp.dot(counts, w, preferred_element_type=jnp.float32)  # (TN, E')
    out_ref[...] = summed / jnp.maximum(lens, 1.0)


def bow_embed(ids, weight, *, tile_n=128):
    """ids: (N, S) int32, weight: (V, E) f32 -> (N, E) f32 (BOW mean)."""
    n, s = ids.shape
    v, e = weight.shape

    # Lane-dense output: pad the embedding axis up to a multiple of 128.
    e_pad = _round_up(e, 128)
    if e_pad != e:
        weight = jnp.pad(weight, ((0, 0), (0, e_pad - e)))

    # Row tiling: sublane-aligned, divisible grid.
    tile_n = min(tile_n, _round_up(n, 8))
    n_pad = _round_up(n, tile_n)
    if n_pad != n:
        ids = jnp.pad(ids, ((0, n_pad - n), (0, 0)), constant_values=PAD_IDX)

    out = pl.pallas_call(
        _bow_kernel,
        out_shape=jax.ShapeDtypeStruct((n_pad, e_pad), jnp.float32),
        grid=(n_pad // tile_n,),
        in_specs=[
            pl.BlockSpec((tile_n, s), lambda i: (i, 0)),
            pl.BlockSpec((v, e_pad), lambda i: (0, 0)),   # table stays resident
        ],
        out_specs=pl.BlockSpec((tile_n, e_pad), lambda i: (i, 0)),
        compiler_params=pltpu.CompilerParams(
            dimension_semantics=("parallel",),
            vmem_limit_bytes=_VMEM_LIMIT),
    )(ids, weight)
    return out[:n, :e]


# ----------------------------------------------------------------------------
# Kernel 2: all MemNN hops fused (attention + weighted sum + query rotation)
# ----------------------------------------------------------------------------
def _make_hop_kernel(hops):
    def hop_kernel(q_ref, inm_ref, outm_ref, bias_ref, wt_ref, o_ref):
        in_m = inm_ref[...]                      # (TB, M, E)
        out_m = outm_ref[...]                    # (TB, M, E)
        bias = bias_ref[...]                     # (TB, M) additive -1e20 mask
        wt = wt_ref[...]                         # (E, E) = rotate_w.T (pre-transposed)
        state0 = q_ref[...]                      # (TB, E)

        def one_hop(_, state):
            attn = jnp.einsum('be,bme->bm', state, in_m,
                              preferred_element_type=jnp.float32) + bias
            attn = attn - jnp.max(attn, axis=1, keepdims=True)
            ex = jnp.exp(attn)
            probs = ex / jnp.sum(ex, axis=1, keepdims=True)        # softmax(dim=1)
            mem_out = jnp.einsum('bm,bme->be', probs, out_m,
                                 preferred_element_type=jnp.float32)
            rot = jnp.dot(state, wt, preferred_element_type=jnp.float32)
            return mem_out + rot

        # hops is a small static int: unrolled in-kernel loop, memories stay
        # VMEM-resident across hops (no per-hop HBM re-read / relaunch).
        o_ref[...] = jax.lax.fori_loop(0, hops, one_hop, state0, unroll=True)

    return hop_kernel


def memory_hops(query_embs, in_mem, out_mem, pad_mask, rotate_w, hops):
    b, e = query_embs.shape
    m = in_mem.shape[1]

    # Fold the pad mask into an additive bias (note: a fully-masked row yields a
    # uniform softmax over -1e20 logits, same as the PyTorch module).
    bias = jnp.where(pad_mask, jnp.float32(NEG_INF), jnp.float32(0.0))
    wt = jnp.transpose(rotate_w)  # pre-transpose on host; kernel has no .T

    tile_b = b if b < 8 else 8
    b_pad = _round_up(b, tile_b)
    if b_pad != b:
        pad = b_pad - b
        query_embs = jnp.pad(query_embs, ((0, pad), (0, 0)))
        in_mem = jnp.pad(in_mem, ((0, pad), (0, 0), (0, 0)))
        out_mem = jnp.pad(out_mem, ((0, pad), (0, 0), (0, 0)))
        bias = jnp.pad(bias, ((0, pad), (0, 0)))

    out = pl.pallas_call(
        _make_hop_kernel(hops),
        out_shape=jax.ShapeDtypeStruct((b_pad, e), jnp.float32),
        grid=(b_pad // tile_b,),
        in_specs=[
            pl.BlockSpec((tile_b, e), lambda i: (i, 0)),
            pl.BlockSpec((tile_b, m, e), lambda i: (i, 0, 0)),
            pl.BlockSpec((tile_b, m, e), lambda i: (i, 0, 0)),
            pl.BlockSpec((tile_b, m), lambda i: (i, 0)),
            pl.BlockSpec((e, e), lambda i: (0, 0)),
        ],
        out_specs=pl.BlockSpec((tile_b, e), lambda i: (i, 0)),
        compiler_params=pltpu.CompilerParams(
            dimension_semantics=("parallel",),
            vmem_limit_bytes=_VMEM_LIMIT),
    )(query_embs, in_mem, out_mem, bias, wt)
    return out[:b]


# ----------------------------------------------------------------------------
# MemNN forward (glue in plain JAX)
# ----------------------------------------------------------------------------
def memnn_forward(params, xs, mems, cands=None, pad_mask=None, hops=1):
    b = xs.shape[0]
    e = params['query_w'].shape[1]
    state = bow_embed(xs, params['query_w'])                         # (B, E)

    if mems is not None:
        _, m, s = mems.shape
        mems_flat = mems.reshape(b * m, s)
        # Fused in/out-memory BOW: single (N, V) @ (V, 2E) matmul, 2E = 128 lanes.
        fused_w = jnp.concatenate([params['in_mem_w'], params['out_mem_w']],
                                  axis=1)                            # (V, 2E)
        fused = bow_embed(mems_flat, fused_w)                        # (B*M, 2E)
        in_mem = fused[:, :e].reshape(b, m, e)
        out_mem = fused[:, e:].reshape(b, m, e)
        msk = (pad_mask if pad_mask is not None
               else jnp.zeros((b, m), dtype=bool))
        state = memory_hops(state, in_mem, out_mem, msk,
                            params['rotate_w'], hops)

    if cands is not None:
        lead = cands.shape[:-1]
        cand_flat = cands.reshape(-1, cands.shape[-1])
        cand_embs = bow_embed(cand_flat, params['answer_w']).reshape(lead + (e,))
    else:
        cand_embs = params['answer_w']
    return state, cand_embs


# ----------------------------------------------------------------------------
# Pure-JAX reference for verification
# ----------------------------------------------------------------------------
def ref_bow(ids, w):
    embs = w[ids]                                                    # (N, S, E)
    summed = embs.sum(axis=-2)
    lens = (ids != PAD_IDX).sum(-1, keepdims=True).astype(jnp.float32)
    return summed / jnp.maximum(lens, 1.0)


def ref_forward(params, xs, mems, cands, pad_mask, hops=1):
    state = ref_bow(xs, params['query_w'])
    b, m, s = mems.shape
    in_mem = ref_bow(mems.reshape(b * m, s), params['in_mem_w']).reshape(b, m, -1)
    out_mem = ref_bow(mems.reshape(b * m, s), params['out_mem_w']).reshape(b, m, -1)
    for _ in range(hops):
        attn = jnp.einsum('be,bme->bm', state, in_mem)
        attn = jnp.where(pad_mask, NEG_INF, attn)
        probs = jax.nn.softmax(attn, axis=1)
        mem_out = jnp.einsum('bm,bme->be', probs, out_mem)
        state = mem_out + state @ params['rotate_w'].T
    cand_embs = ref_bow(cands, params['answer_w'])
    return state, cand_embs


# ----------------------------------------------------------------------------
if __name__ == "__main__":
    # MemNN(num_features=128, embedding_size=64, hops=2, padding_idx=0)
    V, E = 128, 64
    B, S, M, C = 2, 8, 4, 6
    HOPS = 2

    key = jax.random.PRNGKey(0)
    kq, ki, ko, ka, kr, kx, km, kc = jax.random.split(key, 8)

    def emb_weight(k):
        w = 0.1 * jax.random.normal(k, (V, E), jnp.float32)
        # nn.Embedding(padding_idx=0) keeps row 0 at zero (reference relies on it).
        return w.at[PAD_IDX].set(0.0)

    params = {
        'query_w': emb_weight(kq),
        'in_mem_w': emb_weight(ki),
        'out_mem_w': emb_weight(ko),
        'answer_w': emb_weight(ka),
        'rotate_w': 0.1 * jax.random.normal(kr, (E, E), jnp.float32),  # Linear, no bias
    }

    xs = jax.random.randint(kx, (B, S), 0, V, jnp.int32)
    xs = xs.at[:, -2:].set(PAD_IDX)                    # some padding tokens
    mems = jax.random.randint(km, (B, M, S), 0, V, jnp.int32)
    mems = mems.at[:, :, -3:].set(PAD_IDX)
    cands = jax.random.randint(kc, (C, S), 0, V, jnp.int32)
    pad_mask = jnp.array([[False, False, False, True],
                          [False, False, False, False]])

    state, cand_embs = memnn_forward(params, xs, mems, cands, pad_mask, hops=HOPS)
    state = jax.block_until_ready(state)
    cand_embs = jax.block_until_ready(cand_embs)

    ref_state, ref_cands = ref_forward(params, xs, mems, cands, pad_mask, hops=HOPS)
    np.testing.assert_allclose(np.asarray(state), np.asarray(ref_state),
                               rtol=1e-3, atol=1e-3)
    np.testing.assert_allclose(np.asarray(cand_embs), np.asarray(ref_cands),
                               rtol=1e-3, atol=1e-3)

    print("KERNEL_OK")
</pallas_src>

<mosaic_0001>
module attributes {stable_mosaic.version = 11 : i64} {
  func.func @_bow_kernel(%arg0: i32, %arg1: memref<8x8xi32, #tpu.memory_space<vmem>>, %arg2: memref<128x128xf32, #tpu.memory_space<vmem>>, %arg3: memref<8x128xf32, #tpu.memory_space<vmem>>) attributes {dimension_semantics = [#tpu.dimension_semantics<parallel>], iteration_bounds = array<i64: 1>, scalar_prefetch = 0 : i64, scratch_operands = 0 : i64, tpu.core_type = #tpu.core_type<tc>, window_params = [{transform_indices = @transform_0, window_bounds = array<i64: 8, 8>}, {pipeline_mode = #tpu.pipeline_mode<synchronous>, transform_indices = @transform_1, window_bounds = array<i64: 128, 128>}, {transform_indices = @transform_2, window_bounds = array<i64: 8, 128>}]} {
    %c0 = arith.constant 0 : index
    %c0_0 = arith.constant 0 : index
    %0 = vector.load %arg1[%c0, %c0_0] : memref<8x8xi32, #tpu.memory_space<vmem>>, vector<8x8xi32>
    %c0_1 = arith.constant 0 : index
    %c0_2 = arith.constant 0 : index
    %1 = vector.load %arg2[%c0_1, %c0_2] : memref<128x128xf32, #tpu.memory_space<vmem>>, vector<128x128xf32>
    %2 = tpu.iota {dimensions = array<i32: 1>} : vector<8x128xi32>
    %cst = arith.constant 0.000000e+00 : f32
    %3 = vector.broadcast %cst : f32 to vector<8x128xf32>
    %cst_3 = arith.constant 0.000000e+00 : f32
    %4 = vector.broadcast %cst_3 : f32 to vector<8x1xf32>
    %5 = vector.extract_strided_slice %0 {offsets = [0, 0], sizes = [8, 1], strides = [1, 1]} : vector<8x8xi32> to vector<8x1xi32>
    %c0_i32 = arith.constant 0 : i32
    %6 = vector.broadcast %c0_i32 : i32 to vector<8x1xi32>
    %7 = arith.cmpi ne, %5, %6 : vector<8x1xi32>
    %8 = vector.broadcast %5 : vector<8x1xi32> to vector<8x128xi32>
    %9 = arith.cmpi eq, %8, %2 : vector<8x128xi32>
    %10 = vector.broadcast %7 : vector<8x1xi1> to vector<8x128xi1>
    %11 = arith.andi %9, %10 : vector<8x128xi1>
    %12 = arith.extui %11 : vector<8x128xi1> to vector<8x128xi32>
    %13 = arith.sitofp %12 : vector<8x128xi32> to vector<8x128xf32>
    %14 = arith.addf %3, %13 : vector<8x128xf32>
    %15 = arith.extui %7 : vector<8x1xi1> to vector<8x1xi32>
    %16 = arith.sitofp %15 : vector<8x1xi32> to vector<8x1xf32>
    %17 = arith.addf %4, %16 : vector<8x1xf32>
    %18 = vector.extract_strided_slice %0 {offsets = [0, 1], sizes = [8, 1], strides = [1, 1]} : vector<8x8xi32> to vector<8x1xi32>
    %c0_i32_4 = arith.constant 0 : i32
    %19 = vector.broadcast %c0_i32_4 : i32 to vector<8x1xi32>
    %20 = arith.cmpi ne, %18, %19 : vector<8x1xi32>
    %21 = vector.broadcast %18 : vector<8x1xi32> to vector<8x128xi32>
    %22 = arith.cmpi eq, %21, %2 : vector<8x128xi32>
    %23 = vector.broadcast %20 : vector<8x1xi1> to vector<8x128xi1>
    %24 = arith.andi %22, %23 : vector<8x128xi1>
    %25 = arith.extui %24 : vector<8x128xi1> to vector<8x128xi32>
    %26 = arith.sitofp %25 : vector<8x128xi32> to vector<8x128xf32>
    %27 = arith.addf %14, %26 : vector<8x128xf32>
    %28 = arith.extui %20 : vector<8x1xi1> to vector<8x1xi32>
    %29 = arith.sitofp %28 : vector<8x1xi32> to vector<8x1xf32>
    %30 = arith.addf %17, %29 : vector<8x1xf32>
    %31 = vector.extract_strided_slice %0 {offsets = [0, 2], sizes = [8, 1], strides = [1, 1]} : vector<8x8xi32> to vector<8x1xi32>
    %c0_i32_5 = arith.constant 0 : i32
    %32 = vector.broadcast %c0_i32_5 : i32 to vector<8x1xi32>
    %33 = arith.cmpi ne, %31, %32 : vector<8x1xi32>
    %34 = vector.broadcast %31 : vector<8x1xi32> to vector<8x128xi32>
    %35 = arith.cmpi eq, %34, %2 : vector<8x128xi32>
    %36 = vector.broadcast %33 : vector<8x1xi1> to vector<8x128xi1>
    %37 = arith.andi %35, %36 : vector<8x128xi1>
    %38 = arith.extui %37 : vector<8x128xi1> to vector<8x128xi32>
    %39 = arith.sitofp %38 : vector<8x128xi32> to vector<8x128xf32>
    %40 = arith.addf %27, %39 : vector<8x128xf32>
    %41 = arith.extui %33 : vector<8x1xi1> to vector<8x1xi32>
    %42 = arith.sitofp %41 : vector<8x1xi32> to vector<8x1xf32>
    %43 = arith.addf %30, %42 : vector<8x1xf32>
    %44 = vector.extract_strided_slice %0 {offsets = [0, 3], sizes = [8, 1], strides = [1, 1]} : vector<8x8xi32> to vector<8x1xi32>
    %c0_i32_6 = arith.constant 0 : i32
    %45 = vector.broadcast %c0_i32_6 : i32 to vector<8x1xi32>
    %46 = arith.cmpi ne, %44, %45 : vector<8x1xi32>
    %47 = vector.broadcast %44 : vector<8x1xi32> to vector<8x128xi32>
    %48 = arith.cmpi eq, %47, %2 : vector<8x128xi32>
    %49 = vector.broadcast %46 : vector<8x1xi1> to vector<8x128xi1>
    %50 = arith.andi %48, %49 : vector<8x128xi1>
    %51 = arith.extui %50 : vector<8x128xi1> to vector<8x128xi32>
    %52 = arith.sitofp %51 : vector<8x128xi32> to vector<8x128xf32>
    %53 = arith.addf %40, %52 : vector<8x128xf32>
    %54 = arith.extui %46 : vector<8x1xi1> to vector<8x1xi32>
    %55 = arith.sitofp %54 : vector<8x1xi32> to vector<8x1xf32>
    %56 = arith.addf %43, %55 : vector<8x1xf32>
    %57 = vector.extract_strided_slice %0 {offsets = [0, 4], sizes = [8, 1], strides = [1, 1]} : vector<8x8xi32> to vector<8x1xi32>
    %c0_i32_7 = arith.constant 0 : i32
    %58 = vector.broadcast %c0_i32_7 : i32 to vector<8x1xi32>
    %59 = arith.cmpi ne, %57, %58 : vector<8x1xi32>
    %60 = vector.broadcast %57 : vector<8x1xi32> to vector<8x128xi32>
    %61 = arith.cmpi eq, %60, %2 : vector<8x128xi32>
    %62 = vector.broadcast %59 : vector<8x1xi1> to vector<8x128xi1>
    %63 = arith.andi %61, %62 : vector<8x128xi1>
    %64 = arith.extui %63 : vector<8x128xi1> to vector<8x128xi32>
    %65 = arith.sitofp %64 : vector<8x128xi32> to vector<8x128xf32>
    %66 = arith.addf %53, %65 : vector<8x128xf32>
    %67 = arith.extui %59 : vector<8x1xi1> to vector<8x1xi32>
    %68 = arith.sitofp %67 : vector<8x1xi32> to vector<8x1xf32>
    %69 = arith.addf %56, %68 : vector<8x1xf32>
    %70 = vector.extract_strided_slice %0 {offsets = [0, 5], sizes = [8, 1], strides = [1, 1]} : vector<8x8xi32> to vector<8x1xi32>
    %c0_i32_8 = arith.constant 0 : i32
    %71 = vector.broadcast %c0_i32_8 : i32 to vector<8x1xi32>
    %72 = arith.cmpi ne, %70, %71 : vector<8x1xi32>
    %73 = vector.broadcast %70 : vector<8x1xi32> to vector<8x128xi32>
    %74 = arith.cmpi eq, %73, %2 : vector<8x128xi32>
    %75 = vector.broadcast %72 : vector<8x1xi1> to vector<8x128xi1>
    %76 = arith.andi %74, %75 : vector<8x128xi1>
    %77 = arith.extui %76 : vector<8x128xi1> to vector<8x128xi32>
    %78 = arith.sitofp %77 : vector<8x128xi32> to vector<8x128xf32>
    %79 = arith.addf %66, %78 : vector<8x128xf32>
    %80 = arith.extui %72 : vector<8x1xi1> to vector<8x1xi32>
    %81 = arith.sitofp %80 : vector<8x1xi32> to vector<8x1xf32>
    %82 = arith.addf %69, %81 : vector<8x1xf32>
    %83 = vector.extract_strided_slice %0 {offsets = [0, 6], sizes = [8, 1], strides = [1, 1]} : vector<8x8xi32> to vector<8x1xi32>
    %c0_i32_9 = arith.constant 0 : i32
    %84 = vector.broadcast %c0_i32_9 : i32 to vector<8x1xi32>
    %85 = arith.cmpi ne, %83, %84 : vector<8x1xi32>
    %86 = vector.broadcast %83 : vector<8x1xi32> to vector<8x128xi32>
    %87 = arith.cmpi eq, %86, %2 : vector<8x128xi32>
    %88 = vector.broadcast %85 : vector<8x1xi1> to vector<8x128xi1>
    %89 = arith.andi %87, %88 : vector<8x128xi1>
    %90 = arith.extui %89 : vector<8x128xi1> to vector<8x128xi32>
    %91 = arith.sitofp %90 : vector<8x128xi32> to vector<8x128xf32>
    %92 = arith.addf %79, %91 : vector<8x128xf32>
    %93 = arith.extui %85 : vector<8x1xi1> to vector<8x1xi32>
    %94 = arith.sitofp %93 : vector<8x1xi32> to vector<8x1xf32>
    %95 = arith.addf %82, %94 : vector<8x1xf32>
    %96 = vector.extract_strided_slice %0 {offsets = [0, 7], sizes = [8, 1], strides = [1, 1]} : vector<8x8xi32> to vector<8x1xi32>
    %c0_i32_10 = arith.constant 0 : i32
    %97 = vector.broadcast %c0_i32_10 : i32 to vector<8x1xi32>
    %98 = arith.cmpi ne, %96, %97 : vector<8x1xi32>
    %99 = vector.broadcast %96 : vector<8x1xi32> to vector<8x128xi32>
    %100 = arith.cmpi eq, %99, %2 : vector<8x128xi32>
    %101 = vector.broadcast %98 : vector<8x1xi1> to vector<8x128xi1>
    %102 = arith.andi %100, %101 : vector<8x128xi1>
    %103 = arith.extui %102 : vector<8x128xi1> to vector<8x128xi32>
    %104 = arith.sitofp %103 : vector<8x128xi32> to vector<8x128xf32>
    %105 = arith.addf %92, %104 : vector<8x128xf32>
    %106 = arith.extui %98 : vector<8x1xi1> to vector<8x1xi32>
    %107 = arith.sitofp %106 : vector<8x1xi32> to vector<8x1xf32>
    %108 = arith.addf %95, %107 : vector<8x1xf32>
    %cst_11 = arith.constant dense<0.000000e+00> : vector<8x128xf32>
    %109 = tpu.matmul %105, %1, %cst_11 {dimension_numbers = #tpu.dot_dimension_numbers<[1], [0], [0], [1], [0, 0, 1, 1], [], []>} : vector<8x128xf32>, vector<128x128xf32>, vector<8x128xf32> -> vector<8x128xf32>
    %cst_12 = arith.constant 1.000000e+00 : f32
    %110 = vector.broadcast %cst_12 : f32 to vector<8x1xf32>
    %111 = arith.maximumf %108, %110 : vector<8x1xf32>
    %112 = vector.broadcast %111 : vector<8x1xf32> to vector<8x128xf32>
    %113 = arith.divf %109, %112 : vector<8x128xf32>
    %c0_13 = arith.constant 0 : index
    %c0_14 = arith.constant 0 : index
    %114 = vector.load %arg3[%c0_13, %c0_14] : memref<8x128xf32, #tpu.memory_space<vmem>>, vector<8x128xf32>
    tpu.vector_store %arg3[%c0_13, %c0_14], %113 {strides = array<i32>} : memref<8x128xf32, #tpu.memory_space<vmem>>, vector<8x128xf32>,
    return
  }
  func.func @transform_0(%arg0: i32) -> (i32, i32) {
    %c0_i32 = arith.constant 0 : i32
    %c0_i32_0 = arith.constant 0 : i32
    return %arg0, %c0_i32 : i32, i32
  }
  func.func @transform_1(%arg0: i32) -> (i32, i32) {
    %c0_i32 = arith.constant 0 : i32
    %c0_i32_0 = arith.constant 0 : i32
    %c0_i32_1 = arith.constant 0 : i32
    return %c0_i32, %c0_i32_0 : i32, i32
  }
  func.func @transform_2(%arg0: i32) -> (i32, i32) {
    %c0_i32 = arith.constant 0 : i32
    %c0_i32_0 = arith.constant 0 : i32
    return %arg0, %c0_i32 : i32, i32
  }
}

</mosaic_0001>

<bundles_post_ra>
// kernel: tpu_custom_call.1
= control target key start
LH: loop header
LB: loop body
LE: loop exit
PB: predicated region body
PF: predicated region fallthrough
CT: control target
= control target key end

     0   :  { %7 = vsyncpa [#allocation3], 0  ;;  %s607_s0 = inlined_call_operand.hbm [shape: s32[8,8], index: 0, kind: input, shape index: {}]   ;;  %s608_s1 = inlined_call_operand.hbm [shape: f32[128,128], index: 1, kind: input, shape index: {}]   ;;  %s609_s2 = inlined_call_operand.hbm [shape: f32[8,128], index: 2, kind: output, shape index: {}]  }
   0x1   :  { %8 = vsyncpa [#allocation6], 0 }
   0x2   :  { %9 = vsyncpa [#allocation4], 0  ;;  %s477_s9 = smov [#allocation2]   ;;  %s478_s11 = smov [#allocation5]  }
   0x3   :  { %s16_s10 = sshll.u32 %s477_s9, 4  ;;  %s25_s12 = sshll.u32 %s478_s11, 4  ;;  %s17_s10 = int_to_ptr.vmem [resolvable:$true] %s16_s10  ;;  %s515_s12 = int_to_ptr.vmem [resolvable:$true] %s25_s12 }
   0x4   :  { %s405_s15 = scalar_lea.hbm %s607_s0, 128 }
   0x5   :  { %p406_p0 = scmp.ne.s32.totalorder %s607_s0, %s405_s15  ;;  %p409_p1 = scmp.lt.u32.totalorder %s405_s15, %s607_s0 }
   0x7   :  { %p411_p2 = pnand %p409_p1, %p406_p0 }
   0x9   :  { %414 = shalt.err (!%p411_p2)
}
   0xa   :  { %s415_s20 = scalar_lea.vmem %s17_s10, 128  ;;  %p420_p4 = scmp.lt.s32.totalorder %s17_s10, %s17_s10 }
   0xb   :  { %p416_p3 = scmp.ne.s32.totalorder %s17_s10, %s415_s20  ;;  %p421_p5 = scmp.lt.s32.totalorder %s415_s20, %s415_s20 }
   0xd   :  { %p422_p6 = por %p421_p5, %p420_p4 }
   0xf   :  { %p423_p7 = pnand %p422_p6, %p416_p3 }
  0x11   :  { %426 = shalt.err (!%p423_p7)
}
  0x12   :  { %19 = dma.hbm_to_vmem [thread:$0]  %s607_s0, 128, %s17_s10, [#allocation3]  }
  0x13   :  { %s427_s25 = scalar_lea.hbm %s608_s1, 2048 }
  0x14   :  { %p428_p8 = scmp.ne.s32.totalorder %s608_s1, %s427_s25  ;;  %p431_p9 = scmp.lt.u32.totalorder %s427_s25, %s608_s1 }
  0x16   :  { %p433_p10 = pnand %p431_p9, %p428_p8 }
  0x18   :  { %436 = shalt.err (!%p433_p10)
}
  0x19   :  { %s437_s30 = scalar_lea.vmem %s515_s12, 2048  ;;  %p442_p12 = scmp.lt.s32.totalorder %s515_s12, %s515_s12 }
  0x1a   :  { %p438_p11 = scmp.ne.s32.totalorder %s515_s12, %s437_s30  ;;  %p443_p13 = scmp.lt.s32.totalorder %s437_s30, %s437_s30 }
  0x1c   :  { %p444_p0 = por %p443_p13, %p442_p12 }
  0x1e   :  { %p445_p1 = pnand %p444_p0, %p438_p11 }
  0x20   :  { %448 = shalt.err (!%p445_p1)
}
  0x21   :  { %s479_s0 = smov 128   ;;  %s480_s3 = smov 8  }
  0x22   :  { %31 = dma.hbm_to_vmem [thread:$0]  %s608_s1, 2048, %s515_s12, [#allocation6], %s479_s0, %s479_s0, %s480_s3  }
  0x23   :  { %471 = dma.done.wait [#allocation3], 128  }
  0x24   :  { %472 = vsyncadd [#allocation3], 4294967168 }
  0x25   :  { %473 = dma.done.wait [#allocation6], 2048  }
  0x26   :  { %474 = vsyncadd [#allocation6], 4294965248  ;;  %v481_v0 = vmov 1   ;;  %v482_v1 = vmov 0   ;;  %v547_v2 = vld [vmem:[#allocation2] sm:$0xff]  ;;  %v483_v4 = vmov 2   ;;  %v55_v44 = vlaneseq }
  0x27   :  { %390 = vset.pattern.permute.xlu1 %v481_v0  ;;  %389 = vset.pattern.permute.xlu0 %v482_v1  ;;  %vm57_vm0 = vcmp.ne.s32.totalorder %v547_v2, 0  ;;  %v484_v5 = vmov 3   ;;  %v39_v6 = vld [vmem:[#allocation5] sm:$0xff]  ;;  %v40_v7 = vld [vmem:[#allocation5 + $0x8] sm:$0xff]  ;;  %v485_v9 = vmov 0.0|0.0   ;;  %v486_v10 = vmov 4  }
  0x28   :  { %74 = vperm.xlu1 %390, %v547_v2   ;;  %59 = vperm.xlu0 %389, %v547_v2   ;;  %v555_v3 = vsel %vm57_vm0, 1, %v482_v1  ;;  %v343_v8 = vpack.c.bf16 %v40_v7, %v39_v6  ;;  %v487_v11 = vmov 5   ;;  %v41_v12 = vld [vmem:[#allocation5 + $0x10] sm:$0xff]  ;;  %v42_v13 = vld [vmem:[#allocation5 + $0x18] sm:$0xff]  ;;  %v43_v15 = vld [vmem:[#allocation5 + $0x20] sm:$0xff]  ;;  %v488_v17 = vmov 6  }
  0x29   :  { %342 = vmatprep.subr.bf16.mxu0 %v485_v9  ;;  %v346_v14 = vpack.c.bf16 %v42_v13, %v41_v12  ;;  %v44_v16 = vld [vmem:[#allocation5 + $0x28] sm:$0xff]  ;;  %v489_v19 = vmov 0.0   ;;  %v45_v21 = vld [vmem:[#allocation5 + $0x30] sm:$0xff]  ;;  %v46_v22 = vld [vmem:[#allocation5 + $0x38] sm:$0xff]  ;;  %s490_s1 = smov 127   ;;  %s491_s6 = smov 125  }
  0x2a   :  { %344 = vmatpush3.bf16.msra.mxu0 %v343_v8  ;;  %v349_v18 = vpack.c.bf16 %v44_v16, %v43_v15  ;;  %v570_v20 = vsel %vm57_vm0, 1.0, %v489_v19  ;;  %v352_v23 = vpack.c.bf16 %v46_v22, %v45_v21  ;;  %v47_v24 = vld [vmem:[#allocation5 + $0x40] sm:$0xff]  ;;  %v48_v25 = vld [vmem:[#allocation5 + $0x48] sm:$0xff]  ;;  %v49_v27 = vld [vmem:[#allocation5 + $0x50] sm:$0xff]  ;;  %s492_s7 = smov 123   ;;  %v493_v30 = vmov 7  }
  0x2b   :  { %345 = vmatprep.subr.bf16.mxu0 %v485_v9  ;;  %v355_v26 = vpack.c.bf16 %v48_v25, %v47_v24  ;;  %v50_v28 = vld [vmem:[#allocation5 + $0x58] sm:$0xff]  ;;  %v51_v31 = vld [vmem:[#allocation5 + $0x60] sm:$0xff]  ;;  %v52_v32 = vld [vmem:[#allocation5 + $0x68] sm:$0xff]  ;;  %s494_s8 = smov 121   ;;  %s495_s9 = smov 126   ;;  %vm496_vm1 = vmmov 0  }
  0x2c   :  { %78 = vperm.xlu1 %390, %v555_v3   ;;  %64 = vperm.xlu0 %389, %v555_v3   ;;  %v358_v29 = vpack.c.bf16 %v50_v28, %v49_v27  ;;  %v361_v33 = vpack.c.bf16 %v52_v32, %v51_v31  ;;  %v53_v34 = vld [vmem:[#allocation5 + $0x70] sm:$0xff]  ;;  %v54_v35 = vld [vmem:[#allocation5 + $0x78] sm:$0xff]  ;;  %s497_s10 = smov 124   ;;  %s498_s11 = smov 122   ;;  %v56_v46 = vand.u32 127, %v55_v44 }
  0x2d   :  { %v364_v36 = vpack.c.bf16 %v54_v35, %v53_v34  ;;  %339 = vmatprep.mubr.msk.f32.mxu0 %vm496_vm1, %v489_v19  ;;  %s499_s12 = smov [#allocation7]  }
  0x2e   :  { %347 = vmatpush3.bf16.msra.mxu0 %v346_v14  ;;  %s271_s13 = sshll.u32 %s499_s12, 4  ;;  %s272_s13 = int_to_ptr.vmem [resolvable:$true] %s271_s13 }
  0x2f   :  { %348 = vmatprep.subr.bf16.mxu0 %v485_v9  ;;  %s449_s14 = scalar_lea.vmem %s272_s13, 128  ;;  %p454_p3 = scmp.lt.s32.totalorder %s272_s13, %s272_s13 }
  0x30   :  { %392 = vset.pattern.permute.xlu1 %v483_v4  ;;  %391 = vset.pattern.permute.xlu0 %v483_v4  ;;  %p450_p2 = scmp.ne.s32.totalorder %s272_s13, %s449_s14  ;;  %p455_p4 = scmp.lt.s32.totalorder %s449_s14, %s449_s14 }
  0x31   :  { %95 = vperm.xlu1 %392, %v555_v3   ;;  %91 = vperm.xlu0 %391, %v547_v2  }
  0x32   :  { %350 = vmatpush3.bf16.msra.mxu0 %v349_v18  ;;  %p456_p5 = por %p455_p4, %p454_p3 }
  0x33   :  { %351 = vmatprep.subr.bf16.mxu0 %v485_v9 }
  0x34   :  { %p457_p6 = pnand %p456_p5, %p450_p2 }
  0x35   :  { %393 = vset.pattern.permute.xlu1 %v484_v5  ;;  %394 = vset.pattern.permute.xlu0 %v484_v5 }
  0x36   :  { %107 = vperm.xlu1 %393, %v547_v2   ;;  %111 = vperm.xlu0 %394, %v555_v3  }
  0x37   :  { %353 = vmatpush3.bf16.msra.mxu0 %v352_v23 }
  0x38   :  { %354 = vmatprep.subr.bf16.mxu0 %v485_v9 }
  0x3a   :  { %395 = vset.pattern.permute.xlu1 %v486_v10  ;;  %396 = vset.pattern.permute.xlu0 %v487_v11 }
  0x3b   :  { %123 = vperm.xlu1 %395, %v547_v2   ;;  %139 = vperm.xlu0 %396, %v547_v2  }
  0x3c   :  { %356 = vmatpush3.bf16.msra.mxu0 %v355_v26 }
  0x3d   :  { %357 = vmatprep.subr.bf16.mxu0 %v485_v9 }
  0x3f   :  { %127 = vperm.xlu1 %395, %v555_v3   ;;  %399 = vset.pattern.permute.xlu0 %v488_v17 }
  0x40   :  { %159 = vperm.xlu0 %399, %v555_v3   ;;  %359 = vmatpush3.bf16.msra.mxu0 %v358_v29 }
  0x41   :  { %360 = vmatprep.subr.bf16.mxu0 %v485_v9 }
  0x43   :  { %397 = vset.pattern.permute.xlu1 %v487_v11 }
  0x44   :  { %143 = vperm.xlu1 %397, %v555_v3   ;;  %86 = vrot.lane.b32.xlu0 %v570_v20, %s490_s1 }
  0x45   :  { %402 = vset.pattern.permute.xlu0 %v482_v1  ;;  %362 = vmatpush3.bf16.msra.mxu0 %v361_v33 }
  0x46   :  { %363 = vmatprep.subr.bf16.mxu0 %v485_v9 }
  0x48   :  { %398 = vset.pattern.permute.xlu1 %v488_v17  ;;  %118 = vrot.lane.b32.xlu0 %v570_v20, %s491_s6 }
  0x49   :  { %155 = vperm.xlu1 %398, %v547_v2   ;;  %365 = vmatpush3.bf16.msra.mxu0 %v364_v36 }
  0x4c   :  { %150 = vrot.lane.b32.xlu0 %v570_v20, %s492_s7 }
  0x4d   :  { %400 = vset.pattern.permute.xlu1 %v493_v30 }
  0x4e   :  { %171 = vperm.xlu1 %400, %v547_v2  }
  0x50   :  { %182 = vrot.lane.b32.xlu0 %v570_v20, %s494_s8 }
  0x52   :  { %175 = vperm.xlu1 %400, %v555_v3  }
  0x56   :  { %102 = vrot.lane.b32.xlu1 %v570_v20, %s495_s9 }
  0x57   :  { %401 = vset.pattern.permute.xlu1 %v482_v1 }
  0x5a   :  { %134 = vrot.lane.b32.xlu1 %v570_v20, %s497_s10 }
  0x5e   :  { %166 = vrot.lane.b32.xlu1 %v570_v20, %s498_s11 }
  0xa7   :  { %v75_v37 = vpop.permute.xlu1 %74  ;;  %v60_v38 = vpop.permute.xlu0 %59 }
  0xa8   :  { %vm61_vm3 = vcmp.eq.s32.totalorder %v60_v38, %v56_v46  ;;  %vm76_vm5 = vcmp.eq.s32.totalorder %v75_v37, %v56_v46 }
  0xab   :  { %v79_v39 = vpop.permute.xlu1 %78  ;;  %v65_v41 = vpop.permute.xlu0 %64 }
  0xac   :  { %vm80_vm2 = vcmp.eq.s32.totalorder %v79_v39, 1  ;;  %vm66_vm4 = vcmp.eq.s32.totalorder %v65_v41, 1 }
  0xad   :  { %vm81_vm6 = vmand %vm76_vm5, %vm80_vm2 }
  0xae   :  { %vm67_vm9 = vmand %vm61_vm3, %vm66_vm4  ;;  %v283_v51 = vsel %vm81_vm6, 1.0, %v489_v19 }
  0xaf   :  { %v281_v52 = vsel %vm67_vm9, 1.0, %v489_v19 }
  0xb0   :  { %v96_v40 = vpop.permute.xlu1 %95  ;;  %v92_v43 = vpop.permute.xlu0 %91  ;;  %v84_v56 = vadd.f32 %v283_v51, %v281_v52 }
  0xb1   :  { %vm97_vm7 = vcmp.eq.s32.totalorder %v96_v40, 1  ;;  %vm93_vm8 = vcmp.eq.s32.totalorder %v92_v43, %v56_v46 }
  0xb2   :  { %vm98_vm12 = vmand %vm93_vm8, %vm97_vm7 }
  0xb3   :  { %v284_v54 = vsel %vm98_vm12, 1.0, %v489_v19 }
  0xb4   :  { %v101_v58 = vadd.f32 %v284_v54, %v84_v56 }
  0xb5   :  { %v108_v42 = vpop.permute.xlu1 %107  ;;  %v112_v47 = vpop.permute.xlu0 %111 }
  0xb6   :  { %vm109_vm10 = vcmp.eq.s32.totalorder %v108_v42, %v56_v46  ;;  %vm113_vm11 = vcmp.eq.s32.totalorder %v112_v47, 1 }
  0xb7   :  { %vm114_vm14 = vmand %vm109_vm10, %vm113_vm11 }
  0xb8   :  { %v285_v57 = vsel %vm114_vm14, 1.0, %v489_v19 }
  0xb9   :  { %v117_v61 = vadd.f32 %v285_v57, %v101_v58 }
  0xba   :  { %v124_v45 = vpop.permute.xlu1 %123  ;;  %v140_v49 = vpop.permute.xlu0 %139 }
  0xbb   :  { %vm125_vm15 = vcmp.eq.s32.totalorder %v124_v45, %v56_v46  ;;  %vm141_vm1 = vcmp.eq.s32.totalorder %v140_v49, %v56_v46 }
  0xbe   :  { %v128_v48 = vpop.permute.xlu1 %127 }
  0xbf   :  { %vm129_vm13 = vcmp.eq.s32.totalorder %v128_v48, 1  ;;  %v160_v53 = vpop.permute.xlu0 %159 }
  0xc0   :  { %vm130_vm2 = vmand %vm125_vm15, %vm129_vm13  ;;  %vm161_vm4 = vcmp.eq.s32.totalorder %v160_v53, 1 }
  0xc1   :  { %v286_v60 = vsel %vm130_vm2, 1.0, %v489_v19 }
  0xc2   :  { %v133_v0 = vadd.f32 %v286_v60, %v117_v61 }
  0xc3   :  { %v144_v50 = vpop.permute.xlu1 %143  ;;  %v87_v59 = vpop.permute.xlu0 %86 }
  0xc4   :  { %vm145_vm0 = vcmp.eq.s32.totalorder %v144_v50, 1  ;;  %v89_v5 = vadd.f32 %v570_v20, %v87_v59 }
  0xc5   :  { %vm146_vm5 = vmand %vm141_vm1, %vm145_vm0 }
  0xc6   :  { %v287_v63 = vsel %vm146_vm5, 1.0, %v489_v19 }
  0xc7   :  { %v149_v2 = vadd.f32 %v287_v63, %v133_v0  ;;  %v119_v4 = vpop.permute.xlu0 %118 }
  0xc8   :  { %v156_v55 = vpop.permute.xlu1 %155 }
  0xc9   :  { %vm157_vm3 = vcmp.eq.s32.totalorder %v156_v55, %v56_v46 }
  0xca   :  { %vm162_vm6 = vmand %vm157_vm3, %vm161_vm4 }
  0xcb   :  { %v288_v1 = vsel %vm162_vm6, 1.0, %v489_v19  ;;  %v151_v11 = vpop.permute.xlu0 %150 }
  0xcc   :  { %v165_v6 = vadd.f32 %v288_v1, %v149_v2 }
  0xcd   :  { %v172_v62 = vpop.permute.xlu1 %171 }
  0xce   :  { %vm173_vm7 = vcmp.eq.s32.totalorder %v172_v62, %v56_v46 }
  0xcf   :  { %v183_v17 = vpop.permute.xlu0 %182 }
  0xd1   :  { %v176_v3 = vpop.permute.xlu1 %175 }
  0xd2   :  { %vm177_vm8 = vcmp.eq.s32.totalorder %v176_v3, 1 }
  0xd3   :  { %vm178_vm9 = vmand %vm173_vm7, %vm177_vm8 }
  0xd4   :  { %v289_v7 = vsel %vm178_vm9, 1.0, %v489_v19 }
  0xd5   :  { %v181_v8 = vadd.f32 %v289_v7, %v165_v6  ;;  %v103_v9 = vpop.permute.xlu1 %102 }
  0xd6   :  { %v105_v10 = vadd.f32 %v103_v9, %v89_v5 }
  0xd7   :  { %340 = vmatmul.mubr.f32.vlgmr.msra.gmra.mrb[0].mxu0 %v181_v8 }
  0xd8   :  { %v121_v12 = vadd.f32 %v119_v4, %v105_v10 }
  0xd9   :  { %v135_v13 = vpop.permute.xlu1 %134 }
  0xda   :  { %v137_v14 = vadd.f32 %v135_v13, %v121_v12 }
  0xdc   :  { %v153_v15 = vadd.f32 %v151_v11, %v137_v14 }
  0xdd   :  { %v167_v16 = vpop.permute.xlu1 %166 }
  0xde   :  { %v169_v18 = vadd.f32 %v167_v16, %v153_v15 }
  0xe0   :  { %v185_v21 = vadd.f32 %v183_v17, %v169_v18 }
  0xe2   :  { %v256_v22 = vmax.f32 %v185_v21, 1.0 }
  0xe4   :  { %259 = vperm.xlu1 %401, %v256_v22  }
 0x163   :  { %v260_v20 = vpop.permute.xlu1 %259 }
 0x164   :  { %403 = vrcp.f32 %v260_v20 }
 0x16e   :  { %v404_v23 = vpop.eup %403 }
 0x1aa   :  { %v252_v19 = vpop.f32.mrb[0].mxu0 }
 0x1ab   :  { %v263_v24 = vmul.f32 %v404_v23, %v252_v19  ;;  %v341_v25 = vpop.f32.mrb[1].mxu0 }
 0x1ad   :  { %264 = vst [vmem:[#allocation7] sm:$0xff] %v263_v24 }
 0x1ae   :  { %460 = shalt.err (!%p457_p6)
}
 0x1af   :  { %s461_s17 = scalar_lea.hbm %s609_s2, 128 }
 0x1b0   :  { %p462_p7 = scmp.ne.s32.totalorder %s609_s2, %s461_s17  ;;  %p465_p8 = scmp.lt.u32.totalorder %s461_s17, %s609_s2 }
 0x1b2   :  { %p467_p9 = pnand %p465_p8, %p462_p7 }
 0x1b4   :  { %470 = shalt.err (!%p467_p9)
}
 0x1b5   :  { %274 = dma.vmem_to_hbm [thread:$0]  %s272_s13, 128, %s609_s2, [#allocation4]  }
 0x1b6   :  { %475 = dma.done.wait [#allocation4], 128  }
 0x1b7   :  { %476 = vsyncadd [#allocation4], 4294967168 }
 0x1b8   :  { %278 = vsyncpa [#allocation3], 1 }
 0x1b9   :  { %279 = vsyncpa [#allocation6], 1 }
 0x1ba   :  { %280 = vsyncpa [#allocation4], 1 }

</bundles_post_ra>
